<compile_context>
chip_gen: v7x
topology: tpu7x:2x2x1
jax: 0.10.0
libtpu: 0.0.40
codegen_flags: <defaults>
</compile_context>

<pallas_src>
import functools

import numpy as np
import jax
import jax.numpy as jnp
from jax import lax
from jax.experimental import pallas as pl
from jax.experimental.pallas import tpu as pltpu


# ----------------------------------------------------------------------- shared finalize math

def _noise_and_variation(y, noise, var_col, vn_col, hw):
    """out = var*y + (var*noise_level)*std(y)*noise with torch-style unbiased per-row std.
    Two-pass (mean-shifted) variance; masked if the lane dim is padded past hw."""
    hwp = y.shape[-1]
    if hw == hwp:
        mu = jnp.mean(y, axis=-1, keepdims=True)
        d = y - mu
    else:
        mask = (lax.broadcasted_iota(jnp.int32, y.shape, 1) < hw).astype(y.dtype)
        mu = jnp.sum(y * mask, axis=-1, keepdims=True) * (1.0 / hw)
        d = (y - mu) * mask
    std = jnp.sqrt(jnp.sum(d * d, axis=-1, keepdims=True) * (1.0 / (hw - 1.0)))
    return var_col * y + (vn_col * std) * noise.astype(y.dtype)


# ----------------------------------------------------------------------------------- kernels

def _fast_kernel(hw, x_ref, wq_ref, wsc_ref, s_ref, bias_ref, noise_ref, var_ref, vn_ref, o_ref):
    """Single-step path: whole int8 weight resident, no scratch, no branches."""
    x = x_ref[...]                                                       # (npad, hwp) f32
    acc = jnp.dot(x.astype(jnp.bfloat16), wq_ref[...].astype(jnp.bfloat16),
                  preferred_element_type=jnp.float32)                    # (npad, hwp) f32
    # global pre-blur mean:  m = sum_{n,k} x[n,k] * s[k]
    msum = jnp.sum(jnp.sum(x, axis=0, keepdims=True) * s_ref[...],
                   axis=-1, keepdims=True)                               # (1, 1)
    y = acc * wsc_ref[...] + msum * bias_ref[...]                        # dequant + bias
    o_ref[...] = _noise_and_variation(y, noise_ref[...], var_ref[...],
                                      vn_ref[...], hw).astype(o_ref.dtype)


def _streamed_kernel(tn, hw, x_ref, wq_ref, wsc_ref, s_ref, bias_ref, noise_ref,
                     var_ref, vn_ref, o_ref, acc_ref, msum_ref):
    """2-D grid: n = output-column tile (outer), k = reduction tile (inner, last)."""
    n = pl.program_id(0)
    k = pl.program_id(1)
    nn = pl.num_programs(0)
    nk = pl.num_programs(1)

    @pl.when(jnp.logical_and(n == 0, k == 0))
    def _init():
        acc_ref[...] = jnp.zeros_like(acc_ref)
        msum_ref[...] = jnp.zeros_like(msum_ref)

    x = x_ref[...]                                                       # (npad, tk) f32
    col0 = pl.multiple_of(n * tn, tn)
    acc_ref[:, pl.ds(col0, tn)] += jnp.dot(
        x.astype(jnp.bfloat16), wq_ref[...].astype(jnp.bfloat16),
        preferred_element_type=jnp.float32)

    @pl.when(n == 0)                      # accumulate the global mean once per K tile
    def _mean():
        colsum = jnp.sum(x, axis=0, keepdims=True)                       # (1, tk)
        msum_ref[...] += jnp.sum(colsum * s_ref[...], axis=-1, keepdims=True)

    @pl.when(jnp.logical_and(n == nn - 1, k == nk - 1))
    def _finalize():
        y = acc_ref[...] * wsc_ref[...] + msum_ref[...] * bias_ref[...]
        o_ref[...] = _noise_and_variation(y, noise_ref[...], var_ref[...],
                                          vn_ref[...], hw).astype(o_ref.dtype)


# ------------------------------------------------------------------------- pallas_call wrappers

def _largest_tile(total, cap):
    """Largest multiple of 128 dividing `total` (itself a multiple of 128) and <= cap."""
    t = min(total, max(128, (cap // 128) * 128))
    while total % t:
        t -= 128
    return t


def _vmem_limit_bytes(npad, hwp, tk, tn, fast):
    if fast:
        w, x, acc = 2 * hwp * hwp, 2 * npad * hwp * 4, 0
    else:
        w, x, acc = 2 * tk * tn, 2 * npad * tk * 4, npad * hwp * 4
    resident = (2 * npad * hwp * 2        # bf16 noise
                + 2 * npad * hwp * 4      # f32 output
                + 8 * hwp * 4 + 8 * npad * 4)
    est = w + x + acc + resident
    return int(min(max(2 * est, 16 << 20), 40 << 20))


def _call_fast(x_pad, wq, wscale, s_row, bias_row, noise_pad, var_col, vn_col, *, hw, vmem_limit):
    npad, hwp = x_pad.shape
    kern = functools.partial(_fast_kernel, hw)
    return pl.pallas_call(
        kern,
        out_shape=jax.ShapeDtypeStruct((npad, hwp), jnp.float32),
        grid=(1,),
        in_specs=[
            pl.BlockSpec((npad, hwp), lambda i: (0, 0)),   # x
            pl.BlockSpec((hwp, hwp), lambda i: (0, 0)),    # int8 fused weight
            pl.BlockSpec((1, hwp), lambda i: (0, 0)),      # per-column dequant scale
            pl.BlockSpec((1, hwp), lambda i: (0, 0)),      # warp row-sums / (N*HW)
            pl.BlockSpec((1, hwp), lambda i: (0, 0)),      # brightness bias row
            pl.BlockSpec((npad, hwp), lambda i: (0, 0)),   # noise (bf16)
            pl.BlockSpec((npad, 1), lambda i: (0, 0)),     # variations
            pl.BlockSpec((npad, 1), lambda i: (0, 0)),     # variations * noise_level
        ],
        out_specs=pl.BlockSpec((npad, hwp), lambda i: (0, 0)),
        compiler_params=pltpu.CompilerParams(
            dimension_semantics=("arbitrary",),
            vmem_limit_bytes=vmem_limit),
    )(x_pad, wq, wscale, s_row, bias_row, noise_pad, var_col, vn_col)


def _call_streamed(x_pad, wq, wscale, s_row, bias_row, noise_pad, var_col, vn_col,
                   *, hw, tk, tn, vmem_limit):
    npad, hwp = x_pad.shape
    assert hwp % tk == 0 and hwp % tn == 0, (hwp, tk, tn)
    nn, nk = hwp // tn, hwp // tk
    kern = functools.partial(_streamed_kernel, tn, hw)
    return pl.pallas_call(
        kern,
        out_shape=jax.ShapeDtypeStruct((npad, hwp), jnp.float32),
        grid=(nn, nk),                                     # reduction (k) axis last
        in_specs=[
            pl.BlockSpec((npad, tk), lambda n, k: (0, k)),   # x K-slice
            pl.BlockSpec((tk, tn), lambda n, k: (k, n)),     # int8 fused-weight tile
            pl.BlockSpec((1, hwp), lambda n, k: (0, 0)),     # per-column dequant scale
            pl.BlockSpec((1, tk), lambda n, k: (0, k)),      # warp row-sums / (N*HW)
            pl.BlockSpec((1, hwp), lambda n, k: (0, 0)),     # brightness bias row
            pl.BlockSpec((npad, hwp), lambda n, k: (0, 0)),  # noise (bf16, resident)
            pl.BlockSpec((npad, 1), lambda n, k: (0, 0)),    # variations
            pl.BlockSpec((npad, 1), lambda n, k: (0, 0)),    # variations * noise_level
        ],
        out_specs=pl.BlockSpec((npad, hwp), lambda n, k: (0, 0)),
        scratch_shapes=[pltpu.VMEM((npad, hwp), jnp.float32),   # full-row accumulator
                        pltpu.VMEM((1, 1), jnp.float32)],       # global-mean accumulator
        compiler_params=pltpu.CompilerParams(
            dimension_semantics=("arbitrary", "arbitrary"),
            vmem_limit_bytes=vmem_limit),
    )(x_pad, wq, wscale, s_row, bias_row, noise_pad, var_col, vn_col)


# ------------------------------------------------------------------ host-side parameter glue

def make_warp_matrix(H, W, angle_deg, scale):
    """S (HW,HW) with warped_flat = S @ img_flat, matching F.affine_grid + F.grid_sample
    (bilinear, padding_mode='zeros', align_corners=False)."""
    rad = angle_deg * np.pi / 180.0
    t00 = scale * np.cos(rad); t01 = -scale * np.sin(rad)
    t10 = scale * np.sin(rad); t11 = scale * np.cos(rad)
    ii, jj = np.meshgrid(np.arange(H), np.arange(W), indexing="ij")
    xn = (2.0 * jj + 1.0) / W - 1.0
    yn = (2.0 * ii + 1.0) / H - 1.0
    xs = t00 * xn + t01 * yn
    ys = t10 * xn + t11 * yn
    ix = ((xs + 1.0) * W - 1.0) / 2.0
    iy = ((ys + 1.0) * H - 1.0) / 2.0
    x0 = np.floor(ix).astype(np.int64); x1 = x0 + 1
    y0 = np.floor(iy).astype(np.int64); y1 = y0 + 1
    wx1 = ix - x0; wx0 = 1.0 - wx1
    wy1 = iy - y0; wy0 = 1.0 - wy1
    S = np.zeros((H * W, H * W), dtype=np.float32)
    out_idx = (ii * W + jj).ravel()
    for yy, xx, w in ((y0, x0, wy0 * wx0), (y0, x1, wy0 * wx1),
                      (y1, x0, wy1 * wx0), (y1, x1, wy1 * wx1)):
        valid = ((yy >= 0) & (yy < H) & (xx >= 0) & (xx < W)).ravel()
        in_idx = (yy * W + xx).ravel()
        np.add.at(S, (out_idx[valid], in_idx[valid]), w.ravel()[valid])
    return S


def blur_matrix_1d(L, ksize, sigma):
    """1-D Gaussian-blur matrix with reflect padding (torchvision GaussianBlur)."""
    r = ksize // 2
    xs = np.arange(ksize, dtype=np.float64) - r
    g = np.exp(-0.5 * (xs / sigma) ** 2)
    g /= g.sum()
    B = np.zeros((L, L), dtype=np.float32)
    for i in range(L):
        for t in range(ksize):
            j = i + t - r
            if j < 0:
                j = -j
            if j >= L:
                j = 2 * L - 2 - j
            B[i, j] += g[t]
    return B


def build_params(history, channels, H, W, p=0.4, seed=0, force_apply=False):
    """Resolve the module's python random gates / parameters deterministically (seeded).
    Returns None if the top-level gate says 'return x unchanged'; skipped sub-transforms
    contribute identity parameters."""
    rng = np.random.default_rng(seed)
    HW = H * W
    if not force_apply and rng.random() > p:
        return None
    eye = np.eye(HW, dtype=np.float32)

    if force_apply or rng.random() > p:                     # affine warp
        angle = rng.uniform(-30.0, 30.0)
        scale = rng.uniform(0.9, 1.1)
        warpT = make_warp_matrix(H, W, angle, scale).T.astype(np.float32)
    else:
        warpT = eye

    if force_apply or rng.random() > p:                     # brightness / contrast
        brightness = rng.uniform(0.8, 1.2)
        contrast = rng.uniform(0.8, 1.2)
        a, b = brightness * contrast, brightness * (1.0 - contrast)
    else:
        a, b = 1.0, 0.0

    if force_apply or rng.random() > p:                     # gaussian blur
        ksize = int(rng.choice([3, 5]))
        sigma = rng.uniform(0.1, 2.0)
        BH = blur_matrix_1d(H, ksize, sigma)
        BW = blur_matrix_1d(W, ksize, sigma)
        blurT = np.kron(BH, BW).T.astype(np.float32)
    else:
        blurT = eye

    if force_apply or rng.random() > p:                     # per-channel noise levels
        hi = rng.uniform(0.01, 0.03, size=channels)
        lo = rng.uniform(0.005, 0.015, size=channels)
        noise_levels = np.where(np.arange(channels) < 7, hi, lo).astype(np.float32)
    else:
        noise_levels = np.zeros(channels, np.float32)

    if force_apply or rng.random() > p:                     # per-channel variations
        variations = rng.uniform(0.85, 1.15, size=channels).astype(np.float32)
    else:
        variations = np.ones(channels, np.float32)

    nl_row = np.tile(noise_levels, history).reshape(history * channels, 1).astype(np.float32)
    var_row = np.tile(variations, history).reshape(history * channels, 1).astype(np.float32)
    scalars = np.array([a, b], dtype=np.float32)
    return dict(warpT=warpT, blurT=blurT, nl_row=nl_row, var_row=var_row, scalars=scalars)


def _quantize_per_column(w):
    """int8 weight + per-output-column f32 scale (dequant is applied to the accumulator)."""
    scale = np.max(np.abs(w), axis=0, keepdims=True) / 127.0
    scale = np.maximum(scale, 1e-12).astype(np.float32)
    wq = np.clip(np.rint(w / scale), -127, 127).astype(np.int8)
    return wq, scale


def solar_transforms(x, noise, *, p=0.4, seed=0, force_apply=False, tk=None, tn=None):
    history, channels, H, W = x.shape
    params = build_params(history, channels, H, W, p=p, seed=seed, force_apply=force_apply)
    if params is None:
        return x, None, None
    N, HW = history * channels, H * W
    npad = -(-N // 8) * 8                 # sublane-pad rows
    hwp = -(-HW // 128) * 128             # lane-dense pixel padding (unmasked vst / aligned tiles)

    x_pad = np.zeros((npad, hwp), np.float32)
    x_pad[:N, :HW] = np.asarray(x, np.float32).reshape(N, HW)
    noise_pad = np.zeros((npad, hwp), np.float32)
    noise_pad[:N, :HW] = np.asarray(noise, np.float32).reshape(N, HW)

    # ---- algebraic fusion: warp + brightness/contrast + blur -> one matmul + bias row ----
    a, b = float(params["scalars"][0]), float(params["scalars"][1])
    fused = np.zeros((hwp, hwp), np.float32)
    fused[:HW, :HW] = a * (params["warpT"] @ params["blurT"])
    wq, wscale = _quantize_per_column(fused)

    bias_row = np.zeros((1, hwp), np.float32)
    bias_row[0, :HW] = b * params["blurT"].sum(axis=0)
    s_row = np.zeros((1, hwp), np.float32)
    s_row[0, :HW] = params["warpT"].sum(axis=1) / (N * HW)

    var_col = np.ones((npad, 1), np.float32)
    var_col[:N] = params["var_row"]
    vn_col = np.zeros((npad, 1), np.float32)
    vn_col[:N] = params["var_row"] * params["nl_row"]        # folded variations * noise_level

    # ---- path / tile selection, VMEM budgeting ----
    force_streamed = (tk is not None) or (tn is not None)
    fast = (not force_streamed) and (hwp * hwp <= (4 << 20))  # whole int8 weight <= 4 MiB
    if not fast:
        tn = tn if tn is not None else _largest_tile(hwp, 2048)
        tk = tk if tk is not None else _largest_tile(hwp, max(128, (4 << 20) // tn))
    vmem_limit = _vmem_limit_bytes(npad, hwp, tk or 0, tn or 0, fast)

    args = (jnp.asarray(x_pad), jnp.asarray(wq), jnp.asarray(wscale),
            jnp.asarray(s_row), jnp.asarray(bias_row),
            jnp.asarray(noise_pad, dtype=jnp.bfloat16),
            jnp.asarray(var_col), jnp.asarray(vn_col))
    if fast:
        out_pad = _call_fast(*args, hw=HW, vmem_limit=vmem_limit)
    else:
        out_pad = _call_streamed(*args, hw=HW, tk=tk, tn=tn, vmem_limit=vmem_limit)

    out = out_pad[:N, :HW].reshape(history, channels, H, W)
    ops = dict(x_pad=x_pad, noise_pad=noise_pad, wq=wq, wscale=wscale, s_row=s_row,
               bias_row=bias_row, var_col=var_col, vn_col=vn_col, N=N, HW=HW)
    return out, params, ops


# --------------------------------------------------------------------------------- references

def solar_ref_fused(ops):
    """Numpy evaluation of the exact fused/int8-dequant math the kernel computes (f32)."""
    x = ops["x_pad"]
    w = ops["wq"].astype(np.float32) * ops["wscale"]
    msum = float((x.sum(axis=0, keepdims=True) * ops["s_row"]).sum())
    y = x @ w + msum * ops["bias_row"]
    hw, hwp = ops["HW"], y.shape[1]
    mask = np.zeros((1, hwp), np.float32); mask[0, :hw] = 1.0
    mu = (y * mask).sum(-1, keepdims=True) / hw
    d = (y - mu) * mask
    std = np.sqrt((d * d).sum(-1, keepdims=True) / (hw - 1.0))
    out = ops["var_col"] * y + (ops["vn_col"] * std) * ops["noise_pad"]
    return out[:ops["N"], :hw]


def solar_ref_original(x_flat, noise_flat, params):
    """Pure-numpy reference of the original (unfused, f32) transform pipeline."""
    x = x_flat @ params["warpT"]
    m = x.mean()
    x = params["scalars"][0] * x + params["scalars"][1] * m
    x = x @ params["blurT"]
    mu = x.mean(axis=-1, keepdims=True)
    std = np.sqrt(((x - mu) ** 2).sum(-1, keepdims=True) / (x.shape[-1] - 1))
    x = x + noise_flat * params["nl_row"] * std
    x = x * params["var_row"]
    return x.astype(np.float32)


# --------------------------------------------------------------------------------------- demo

if __name__ == "__main__":
    key = jax.random.PRNGKey(0)
    kx, kn = jax.random.split(key)
    history, channels, H, W = 2, 10, 16, 16   # channel_mask = arange(10) -> 10 channels
    # Non-zero mean so the global-mean (brightness/contrast bias) path is actually exercised.
    x = 1.0 + jax.random.normal(kx, (history, channels, H, W), dtype=jnp.float32)
    noise = jax.random.normal(kn, (history, channels, H, W), dtype=jnp.float32)

    # Default: single-step fast path (whole int8 weight resident, overhead-minimized).
    out_fast, params, ops = solar_transforms(x, noise, p=0.4, seed=0, force_apply=True)
    out_fast = jax.block_until_ready(out_fast)
    assert out_fast.shape == x.shape and out_fast.dtype == jnp.float32

    # Streamed path (the one large images take): column + reduction tiling, grid (2, 2).
    out_tiled, _, _ = solar_transforms(x, noise, p=0.4, seed=0, force_apply=True,
                                       tk=128, tn=128)
    out_tiled = jax.block_until_ready(out_tiled)

    N, HW = history * channels, H * W
    ref_exact = solar_ref_fused(ops)
    ref_orig = solar_ref_original(
        np.asarray(x, np.float32).reshape(N, HW),
        np.asarray(noise, np.float32).reshape(N, HW), params)

    for o in (out_fast, out_tiled):
        o = np.asarray(o).reshape(N, HW)
        # tight: kernel vs the exact fused math (only bf16 activation / MXU rounding differ)
        np.testing.assert_allclose(o, ref_exact, rtol=2e-2, atol=2e-2)
        # loose: vs the original unfused f32 pipeline (adds the int8 weight-quant budget)
        np.testing.assert_allclose(o, ref_orig, rtol=6e-2, atol=6e-2)
    print("KERNEL_OK")
</pallas_src>

<mosaic_0001>
module attributes {stable_mosaic.version = 11 : i64} {
  func.func @_fast_kernel(%arg0: i32, %arg1: memref<24x256xf32, #tpu.memory_space<vmem>>, %arg2: memref<256x256xi8, #tpu.memory_space<vmem>>, %arg3: memref<1x256xf32, #tpu.memory_space<vmem>>, %arg4: memref<1x256xf32, #tpu.memory_space<vmem>>, %arg5: memref<1x256xf32, #tpu.memory_space<vmem>>, %arg6: memref<24x256xbf16, #tpu.memory_space<vmem>>, %arg7: memref<24x1xf32, #tpu.memory_space<vmem>>, %arg8: memref<24x1xf32, #tpu.memory_space<vmem>>, %arg9: memref<24x256xf32, #tpu.memory_space<vmem>>) attributes {dimension_semantics = [#tpu.dimension_semantics<arbitrary>], iteration_bounds = array<i64: 1>, scalar_prefetch = 0 : i64, scratch_operands = 0 : i64, tpu.core_type = #tpu.core_type<tc>, window_params = [{pipeline_mode = #tpu.pipeline_mode<synchronous>, transform_indices = @transform_0, window_bounds = array<i64: 24, 256>}, {pipeline_mode = #tpu.pipeline_mode<synchronous>, transform_indices = @transform_1, window_bounds = array<i64: 256, 256>}, {pipeline_mode = #tpu.pipeline_mode<synchronous>, transform_indices = @transform_2, window_bounds = array<i64: 1, 256>}, {pipeline_mode = #tpu.pipeline_mode<synchronous>, transform_indices = @transform_3, window_bounds = array<i64: 1, 256>}, {pipeline_mode = #tpu.pipeline_mode<synchronous>, transform_indices = @transform_4, window_bounds = array<i64: 1, 256>}, {pipeline_mode = #tpu.pipeline_mode<synchronous>, transform_indices = @transform_5, window_bounds = array<i64: 24, 256>}, {pipeline_mode = #tpu.pipeline_mode<synchronous>, transform_indices = @transform_6, window_bounds = array<i64: 24, 1>}, {pipeline_mode = #tpu.pipeline_mode<synchronous>, transform_indices = @transform_7, window_bounds = array<i64: 24, 1>}, {pipeline_mode = #tpu.pipeline_mode<synchronous>, transform_indices = @transform_8, window_bounds = array<i64: 24, 256>}]} {
    %c0 = arith.constant 0 : index
    %c0_0 = arith.constant 0 : index
    %0 = vector.load %arg1[%c0, %c0_0] : memref<24x256xf32, #tpu.memory_space<vmem>>, vector<24x256xf32>
    %1 = arith.truncf %0 : vector<24x256xf32> to vector<24x256xbf16>
    %c0_1 = arith.constant 0 : index
    %c0_2 = arith.constant 0 : index
    %2 = vector.load %arg2[%c0_1, %c0_2] : memref<256x256xi8, #tpu.memory_space<vmem>>, vector<256x256xi8>
    %3 = arith.sitofp %2 : vector<256x256xi8> to vector<256x256xbf16>
    %cst = arith.constant dense<0.000000e+00> : vector<24x256xf32>
    %4 = tpu.matmul %1, %3, %cst {dimension_numbers = #tpu.dot_dimension_numbers<[1], [0], [0], [1], [0, 0, 1, 1], [], []>} : vector<24x256xbf16>, vector<256x256xbf16>, vector<24x256xf32> -> vector<24x256xf32>
    %cst_3 = arith.constant dense<0.000000e+00> : vector<256xf32>
    %5 = vector.multi_reduction <add>, %0, %cst_3 [0] : vector<24x256xf32> to vector<256xf32>
    %6 = vector.shape_cast %5 : vector<256xf32> to vector<1x256xf32>
    %c0_4 = arith.constant 0 : index
    %c0_5 = arith.constant 0 : index
    %7 = vector.load %arg4[%c0_4, %c0_5] : memref<1x256xf32, #tpu.memory_space<vmem>>, vector<1x256xf32>
    %8 = arith.mulf %6, %7 : vector<1x256xf32>
    %cst_6 = arith.constant dense<0.000000e+00> : vector<1xf32>
    %9 = vector.multi_reduction <add>, %8, %cst_6 [1] : vector<1x256xf32> to vector<1xf32>
    %10 = vector.shape_cast %9 : vector<1xf32> to vector<1x1xf32>
    %c0_7 = arith.constant 0 : index
    %c0_8 = arith.constant 0 : index
    %11 = vector.load %arg3[%c0_7, %c0_8] : memref<1x256xf32, #tpu.memory_space<vmem>>, vector<1x256xf32>
    %12 = vector.broadcast %11 : vector<1x256xf32> to vector<24x256xf32>
    %13 = arith.mulf %4, %12 : vector<24x256xf32>
    %c0_9 = arith.constant 0 : index
    %c0_10 = arith.constant 0 : index
    %14 = vector.load %arg5[%c0_9, %c0_10] : memref<1x256xf32, #tpu.memory_space<vmem>>, vector<1x256xf32>
    %15 = vector.broadcast %10 : vector<1x1xf32> to vector<1x256xf32>
    %16 = arith.mulf %15, %14 : vector<1x256xf32>
    %17 = vector.broadcast %16 : vector<1x256xf32> to vector<24x256xf32>
    %18 = arith.addf %13, %17 : vector<24x256xf32>
    %c0_11 = arith.constant 0 : index
    %c0_12 = arith.constant 0 : index
    %19 = vector.load %arg6[%c0_11, %c0_12] : memref<24x256xbf16, #tpu.memory_space<vmem>>, vector<24x256xbf16>
    %c0_13 = arith.constant 0 : index
    %c0_14 = arith.constant 0 : index
    %20 = vector.load %arg7[%c0_13, %c0_14] : memref<24x1xf32, #tpu.memory_space<vmem>>, vector<24x1xf32>
    %c0_15 = arith.constant 0 : index
    %c0_16 = arith.constant 0 : index
    %21 = vector.load %arg8[%c0_15, %c0_16] : memref<24x1xf32, #tpu.memory_space<vmem>>, vector<24x1xf32>
    %cst_17 = arith.constant dense<0.000000e+00> : vector<24xf32>
    %22 = vector.multi_reduction <add>, %18, %cst_17 [1] : vector<24x256xf32> to vector<24xf32>
    %23 = vector.shape_cast %22 : vector<24xf32> to vector<24x1xf32>
    %cst_18 = arith.constant 2.560000e+02 : f32
    %24 = vector.broadcast %cst_18 : f32 to vector<24x1xf32>
    %25 = arith.divf %23, %24 : vector<24x1xf32>
    %26 = vector.broadcast %25 : vector<24x1xf32> to vector<24x256xf32>
    %27 = arith.subf %18, %26 : vector<24x256xf32>
    %28 = arith.mulf %27, %27 : vector<24x256xf32>
    %cst_19 = arith.constant dense<0.000000e+00> : vector<24xf32>
    %29 = vector.multi_reduction <add>, %28, %cst_19 [1] : vector<24x256xf32> to vector<24xf32>
    %30 = vector.shape_cast %29 : vector<24xf32> to vector<24x1xf32>
    %cst_20 = arith.constant 0.00392156886 : f32
    %31 = vector.broadcast %cst_20 : f32 to vector<24x1xf32>
    %32 = arith.mulf %30, %31 : vector<24x1xf32>
    %33 = math.sqrt %32 : vector<24x1xf32>
    %34 = vector.broadcast %20 : vector<24x1xf32> to vector<24x256xf32>
    %35 = arith.mulf %34, %18 : vector<24x256xf32>
    %36 = arith.mulf %21, %33 : vector<24x1xf32>
    %37 = arith.extf %19 : vector<24x256xbf16> to vector<24x256xf32>
    %38 = vector.broadcast %36 : vector<24x1xf32> to vector<24x256xf32>
    %39 = arith.mulf %38, %37 : vector<24x256xf32>
    %40 = arith.addf %35, %39 : vector<24x256xf32>
    %c0_21 = arith.constant 0 : index
    %c0_22 = arith.constant 0 : index
    %41 = vector.load %arg9[%c0_21, %c0_22] : memref<24x256xf32, #tpu.memory_space<vmem>>, vector<24x256xf32>
    tpu.vector_store %arg9[%c0_21, %c0_22], %40 {strides = array<i32>} : memref<24x256xf32, #tpu.memory_space<vmem>>, vector<24x256xf32>,
    return
  }
  func.func @transform_0(%arg0: i32) -> (i32, i32) {
    %c0_i32 = arith.constant 0 : i32
    %c0_i32_0 = arith.constant 0 : i32
    %c0_i32_1 = arith.constant 0 : i32
    return %c0_i32, %c0_i32_0 : i32, i32
  }
  func.func @transform_1(%arg0: i32) -> (i32, i32) {
    %c0_i32 = arith.constant 0 : i32
    %c0_i32_0 = arith.constant 0 : i32
    %c0_i32_1 = arith.constant 0 : i32
    return %c0_i32, %c0_i32_0 : i32, i32
  }
  func.func @transform_2(%arg0: i32) -> (i32, i32) {
    %c0_i32 = arith.constant 0 : i32
    %c0_i32_0 = arith.constant 0 : i32
    %c0_i32_1 = arith.constant 0 : i32
    return %c0_i32, %c0_i32_0 : i32, i32
  }
  func.func @transform_3(%arg0: i32) -> (i32, i32) {
    %c0_i32 = arith.constant 0 : i32
    %c0_i32_0 = arith.constant 0 : i32
    %c0_i32_1 = arith.constant 0 : i32
    return %c0_i32, %c0_i32_0 : i32, i32
  }
  func.func @transform_4(%arg0: i32) -> (i32, i32) {
    %c0_i32 = arith.constant 0 : i32
    %c0_i32_0 = arith.constant 0 : i32
    %c0_i32_1 = arith.constant 0 : i32
    return %c0_i32, %c0_i32_0 : i32, i32
  }
  func.func @transform_5(%arg0: i32) -> (i32, i32) {
    %c0_i32 = arith.constant 0 : i32
    %c0_i32_0 = arith.constant 0 : i32
    %c0_i32_1 = arith.constant 0 : i32
    return %c0_i32, %c0_i32_0 : i32, i32
  }
  func.func @transform_6(%arg0: i32) -> (i32, i32) {
    %c0_i32 = arith.constant 0 : i32
    %c0_i32_0 = arith.constant 0 : i32
    %c0_i32_1 = arith.constant 0 : i32
    return %c0_i32, %c0_i32_0 : i32, i32
  }
  func.func @transform_7(%arg0: i32) -> (i32, i32) {
    %c0_i32 = arith.constant 0 : i32
    %c0_i32_0 = arith.constant 0 : i32
    %c0_i32_1 = arith.constant 0 : i32
    return %c0_i32, %c0_i32_0 : i32, i32
  }
  func.func @transform_8(%arg0: i32) -> (i32, i32) {
    %c0_i32 = arith.constant 0 : i32
    %c0_i32_0 = arith.constant 0 : i32
    %c0_i32_1 = arith.constant 0 : i32
    return %c0_i32, %c0_i32_0 : i32, i32
  }
}

</mosaic_0001>

<bundles_post_ra>
// kernel: tpu_custom_call.1
= control target key start
LH: loop header
LB: loop body
LE: loop exit
PB: predicated region body
PF: predicated region fallthrough
CT: control target
= control target key end

     0   :  { %13 = vsyncpa [#allocation3], 0  ;;  %s712_s0 = inlined_call_operand.vmem [shape: f32[24,256], index: 0, kind: input, shape index: {}]   ;;  %s713_s1 = inlined_call_operand.hbm [shape: s8[256,256], index: 1, kind: input, shape index: {}]   ;;  %s714_s2 = inlined_call_operand.vmem [shape: f32[1,256], index: 2, kind: input, shape index: {}]   ;;  %s715_s3 = inlined_call_operand.vmem [shape: f32[1,256], index: 3, kind: input, shape index: {}]   ;;  %s716_s4 = inlined_call_operand.vmem [shape: f32[1,256], index: 4, kind: input, shape index: {}]   ;;  %s717_s5 = inlined_call_operand.hbm [shape: bf16[24,256], index: 5, kind: input, shape index: {}]   ;;  %s718_s6 = inlined_call_operand.vmem [shape: f32[24,1], index: 6, kind: input, shape index: {}]   ;;  %s719_s7 = inlined_call_operand.vmem [shape: f32[24,1], index: 7, kind: input, shape index: {}]   ;;  %s720_s8 = inlined_call_operand.hbm [shape: f32[24,256], index: 8, kind: output, shape index: {}]  }
   0x1   :  { %14 = vsyncpa [#allocation6], 0 }
   0x2   :  { %15 = vsyncpa [#allocation4], 0  ;;  %s517_s27 = smov [#allocation2]   ;;  %s445_s9 = scalar_lea.hbm %s713_s1, 2048 }
   0x3   :  { %s23_s28 = sshll.u32 %s517_s27, 4  ;;  %p446_p0 = scmp.ne.s32.totalorder %s713_s1, %s445_s9  ;;  %s24_s28 = int_to_ptr.vmem [resolvable:$true] %s23_s28 }
   0x4   :  { %p449_p1 = scmp.lt.u32.totalorder %s445_s9, %s713_s1 }
   0x6   :  { %p451_p2 = pnand %p449_p1, %p446_p0 }
   0x8   :  { %454 = shalt.err (!%p451_p2)
}
   0x9   :  { %s455_s14 = scalar_lea.vmem %s24_s28, 2048  ;;  %p460_p4 = scmp.lt.s32.totalorder %s24_s28, %s24_s28 }
   0xa   :  { %p456_p3 = scmp.ne.s32.totalorder %s24_s28, %s455_s14  ;;  %p461_p5 = scmp.lt.s32.totalorder %s455_s14, %s455_s14 }
   0xc   :  { %p462_p6 = por %p461_p5, %p460_p4 }
   0xe   :  { %p463_p7 = pnand %p462_p6, %p456_p3 }
  0x10   :  { %466 = shalt.err (!%p463_p7)
}
  0x11   :  { %s518_s15 = smov 256   ;;  %s519_s16 = smov 16  }
  0x12   :  { %29 = dma.hbm_to_vmem [thread:$0]  %s713_s1, 2048, %s24_s28, [#allocation3], %s518_s15, %s518_s15, %s519_s16  }
  0x13   :  { %s520_s19 = smov [#allocation5]   ;;  %s467_s23 = scalar_lea.hbm %s717_s5, 384 }
  0x14   :  { %s41_s20 = sshll.u32 %s520_s19, 4  ;;  %p468_p8 = scmp.ne.s32.totalorder %s717_s5, %s467_s23  ;;  %s42_s20 = int_to_ptr.vmem [resolvable:$true] %s41_s20 }
  0x15   :  { %p471_p9 = scmp.lt.u32.totalorder %s467_s23, %s717_s5 }
  0x17   :  { %p473_p10 = pnand %p471_p9, %p468_p8 }
  0x19   :  { %476 = shalt.err (!%p473_p10)
}
  0x1a   :  { %s477_s29 = scalar_lea.vmem %s42_s20, 384  ;;  %p482_p12 = scmp.lt.s32.totalorder %s42_s20, %s42_s20 }
  0x1b   :  { %p478_p11 = scmp.ne.s32.totalorder %s42_s20, %s477_s29  ;;  %p483_p13 = scmp.lt.s32.totalorder %s477_s29, %s477_s29 }
  0x1d   :  { %p484_p0 = por %p483_p13, %p482_p12 }
  0x1f   :  { %p485_p1 = pnand %p484_p0, %p478_p11 }
  0x21   :  { %488 = shalt.err (!%p485_p1)
}
  0x22   :  { %s521_s1 = smov 128   ;;  %s522_s28 = smov 8  }
  0x23   :  { %47 = dma.hbm_to_vmem [thread:$0]  %s717_s5, 384, %s42_s20, [#allocation6], %s521_s1, %s521_s1, %s522_s28  }
  0x24   :  { %511 = dma.done.wait [#allocation3], 2048  }
  0x25   :  { %512 = vsyncadd [#allocation3], 4294965248 }
  0x26   :  { %513 = dma.done.wait [#allocation6], 384  }
  0x27   :  { %514 = vsyncadd [#allocation6], 4294966912  ;;  %v69_v0 = vld [vmem:[#allocation2 + $0x8] sm:$0xff]  ;;  %v68_v1 = vld [vmem:[#allocation2] sm:$0xff]  ;;  %v185_v13 = vlaneseq  ;;  %vm197_vm0 = vcmask 1040384  }
  0x28   :  { %v85_v2 = vunpack.c.l.s8.bf16 %v69_v0  ;;  %v87_v3 = vunpack.c.h.s8.bf16 %v69_v0  ;;  %v84_v4 = vunpack.c.l.s8.bf16 %v68_v1  ;;  %v71_v5 = vld [vmem:[#allocation2 + $0x18] sm:$0xff]  ;;  %v86_v6 = vunpack.c.h.s8.bf16 %v68_v1  ;;  %v70_v8 = vld [vmem:[#allocation2 + $0x10] sm:$0xff]  ;;  %v59_v9 = vld [vmem:[%s712_s0 + $0x8] sm:$0xff] }
  0x29   :  { %v89_v7 = vunpack.c.l.s8.bf16 %v71_v5  ;;  %v61_v10 = vld [vmem:[%s712_s0 + $0x18] sm:$0xff]  ;;  %v63_v11 = vld [vmem:[%s712_s0 + $0x28] sm:$0xff]  ;;  %v88_v12 = vunpack.c.l.s8.bf16 %v70_v8  ;;  %v91_v14 = vunpack.c.h.s8.bf16 %v71_v5  ;;  %v609_v18 = vld [vmem:[%s712_s0] sm:$0xff]  ;;  %v90_v24 = vunpack.c.h.s8.bf16 %v70_v8 }
  0x2a   :  { %116 = vmatprep.subr.bf16.mxu0 %v85_v2  ;;  %397 = vmatprep.subr.bf16.mxu1 %v85_v2  ;;  %v65_v15 = vpack.c.bf16 %v61_v10, %v59_v9  ;;  %v175_v16 = vadd.f32 %v61_v10, %v59_v9  ;;  %v67_v17 = vpack.c.bf16 %v63_v11, %v63_v11  ;;  %v614_v19 = vld [vmem:[%s712_s0 + $0x10] sm:$0xff]  ;;  %v73_v20 = vld [vmem:[#allocation2 + $0x28] sm:$0xff]  ;;  %v621_v23 = vld [vmem:[%s712_s0 + $0x20] sm:$0xff]  ;;  %v186_v29 = vshrl.u32 %v185_v13, 7 }
  0x2b   :  { %117 = vmatpush1.bf16.msra.mxu0 %v84_v4  ;;  %413 = vmatpush1.bf16.msra.mxu1 %v84_v4  ;;  %v167_v21 = vadd.f32 %v614_v19, %v609_v18  ;;  %v93_v26 = vunpack.c.l.s8.bf16 %v73_v20  ;;  %v72_v27 = vld [vmem:[#allocation2 + $0x20] sm:$0xff]  ;;  %v95_v34 = vunpack.c.h.s8.bf16 %v73_v20  ;;  %v75_v37 = vld [vmem:[#allocation2 + $0x38] sm:$0xff]  ;;  %v74_v45 = vld [vmem:[#allocation2 + $0x30] sm:$0xff] }
  0x2c   :  { %118 = vmatprep.subr.bf16.mxu0 %v87_v3  ;;  %398 = vmatprep.subr.bf16.mxu1 %v87_v3  ;;  %v176_v22 = vadd.f32 %v175_v16, %v63_v11  ;;  %v92_v32 = vunpack.c.l.s8.bf16 %v72_v27  ;;  %v624_v36 = vsub.s32 1, %v186_v29  ;;  %v183_v39 = vld [vmem:[%s715_s3] sm:$0x3]  ;;  %v629_v40 = vsub.s32 0, %v186_v29  ;;  %v77_v55 = vld [vmem:[#allocation2 + $0x48] sm:$0xff]  ;;  %v79_v1 = vld [vmem:[#allocation2 + $0x58] sm:$0xff] }
  0x2d   :  { %148 = vmatprep.mubr.bf16.mxu0 %v65_v15  ;;  %158 = vmatprep.mubr.bf16.mxu1 %v67_v17  ;;  %v168_v25 = vadd.f32 %v167_v21, %v621_v23  ;;  %v94_v42 = vunpack.c.h.s8.bf16 %v72_v27  ;;  %v97_v44 = vunpack.c.l.s8.bf16 %v75_v37  ;;  %v96_v51 = vunpack.c.l.s8.bf16 %v74_v45  ;;  %v76_v61 = vld [vmem:[#allocation2 + $0x40] sm:$0xff]  ;;  %v78_v4 = vld [vmem:[#allocation2 + $0x50] sm:$0xff]  ;;  %v83_v13 = vld [vmem:[#allocation2 + $0x78] sm:$0xff] }
  0x2e   :  { %v177_v28 = vrot.slane %v176_v22, 4  ;;  %v192_v47 = vrot.slane %v183_v39, %v624_v36  ;;  %v188_v49 = vrot.slane %v183_v39, %v629_v40  ;;  %v99_v53 = vunpack.c.h.s8.bf16 %v75_v37  ;;  %v80_v10 = vld [vmem:[#allocation2 + $0x60] sm:$0xff]  ;;  %v82_v16 = vld [vmem:[#allocation2 + $0x70] sm:$0xff] }
  0x2f   :  { %119 = vmatpush1.bf16.msra.mxu0 %v86_v6  ;;  %414 = vmatpush1.bf16.msra.mxu1 %v86_v6  ;;  %v169_v30 = vrot.slane %v168_v25, 4  ;;  %v98_v58 = vunpack.c.h.s8.bf16 %v74_v45  ;;  %v101_v60 = vunpack.c.l.s8.bf16 %v77_v55  ;;  %v100_v63 = vunpack.c.l.s8.bf16 %v76_v61 }
  0x30   :  { %120 = vmatprep.subr.bf16.mxu0 %v89_v7  ;;  %399 = vmatprep.subr.bf16.mxu1 %v89_v7  ;;  %v178_v31 = vadd.f32 %v177_v28, %v176_v22  ;;  %v103_v0 = vunpack.c.h.s8.bf16 %v77_v55  ;;  %v102_v2 = vunpack.c.h.s8.bf16 %v76_v61  ;;  %v105_v3 = vunpack.c.l.s8.bf16 %v79_v1  ;;  %v81_v7 = vld [vmem:[#allocation2 + $0x68] sm:$0xff] }
  0x31   :  { %v170_v33 = vadd.f32 %v169_v30, %v168_v25  ;;  %v104_v5 = vunpack.c.l.s8.bf16 %v78_v4  ;;  %v107_v6 = vunpack.c.h.s8.bf16 %v79_v1  ;;  %v106_v8 = vunpack.c.h.s8.bf16 %v78_v4  ;;  %v221_v25 = vld [vmem:[%s716_s4] sm:$0x3] }
  0x32   :  { %v179_v35 = vrot.slane %v178_v31, 2  ;;  %v109_v9 = vunpack.c.l.s8.bf16 %v81_v7  ;;  %v108_v11 = vunpack.c.l.s8.bf16 %v80_v10  ;;  %v113_v15 = vunpack.c.l.s8.bf16 %v83_v13 }
  0x33   :  { %121 = vmatpush1.bf16.msra.mxu0 %v88_v12  ;;  %415 = vmatpush1.bf16.msra.mxu1 %v88_v12  ;;  %v171_v38 = vrot.slane %v170_v33, 2  ;;  %v111_v12 = vunpack.c.h.s8.bf16 %v81_v7  ;;  %v112_v17 = vunpack.c.l.s8.bf16 %v82_v16  ;;  %v115_v20 = vunpack.c.h.s8.bf16 %v83_v13 }
  0x34   :  { %122 = vmatprep.subr.bf16.mxu0 %v91_v14  ;;  %400 = vmatprep.subr.bf16.mxu1 %v91_v14  ;;  %v180_v41 = vadd.f32 %v179_v35, %v178_v31  ;;  %v110_v14 = vunpack.c.h.s8.bf16 %v80_v10  ;;  %v114_v21 = vunpack.c.h.s8.bf16 %v82_v16  ;;  %v64_v22 = vpack.c.bf16 %v614_v19, %v609_v18  ;;  %v203_v18 = vld [vmem:[%s714_s2] sm:$0x3]  ;;  %v253_v16 = vld [vmem:[%s718_s6 + $0x8] sm:$0xff] }
  0x35   :  { %v172_v43 = vadd.f32 %v171_v38, %v170_v33  ;;  %v230_v27 = vrot.slane %v221_v25, %v624_v36  ;;  %v212_v30 = vrot.slane %v203_v18, %v624_v36 }
  0x36   :  { %v181_v46 = vrot.slane %v180_v41, 1 }
  0x37   :  { %123 = vmatpush1.bf16.msra.mxu0 %v90_v24  ;;  %416 = vmatpush1.bf16.msra.mxu1 %v90_v24  ;;  %v173_v48 = vrot.slane %v172_v43, 1  ;;  %v66_v24 = vpack.c.bf16 %v621_v23, %v621_v23  ;;  %v208_v23 = vrot.slane %v203_v18, %v629_v40  ;;  %v255_v18 = vld [vmem:[%s719_s7] sm:$0xff] }
  0x38   :  { %124 = vmatprep.subr.bf16.mxu0 %v93_v26  ;;  %401 = vmatprep.subr.bf16.mxu1 %v93_v26  ;;  %v182_v50 = vadd.f32 %v181_v46, %v180_v41  ;;  %v226_v26 = vrot.slane %v221_v25, %v629_v40 }
  0x39   :  { %v174_v52 = vadd.f32 %v173_v48, %v172_v43 }
  0x3a   :  { %v196_v54 = vmul.f32 %v192_v47, %v182_v50 }
  0x3b   :  { %125 = vmatpush1.bf16.msra.mxu0 %v92_v32  ;;  %417 = vmatpush1.bf16.msra.mxu1 %v92_v32  ;;  %v195_v56 = vmul.f32 %v188_v49, %v174_v52 }
  0x3c   :  { %126 = vmatprep.subr.bf16.mxu0 %v95_v34  ;;  %402 = vmatprep.subr.bf16.mxu1 %v95_v34  ;;  %v199_v57 = vsel %vm197_vm0, %v196_v54, 0.0 }
  0x3d   :  { %v198_v59 = vsel %vm197_vm0, %v195_v56, 0.0  ;;  %v523_v56 = vmov 0  }
  0x3e   :  { %v200_v62 = vadd.f32 %v199_v57, %v198_v59  ;;  %437 = vset.pattern.permute.xlu1 %v523_v56  ;;  %438 = vset.pattern.permute.xlu0 %v523_v56 }
  0x3f   :  { %127 = vmatpush1.bf16.msra.mxu0 %v94_v42  ;;  %418 = vmatpush1.bf16.msra.mxu1 %v94_v42 }
  0x40   :  { %128 = vmatprep.subr.bf16.mxu0 %v97_v44  ;;  %403 = vmatprep.subr.bf16.mxu1 %v97_v44 }
  0x41   :  { %201 = vadd.xlane.f32.xlu0 %v200_v62 }
  0x43   :  { %129 = vmatpush1.bf16.msra.mxu0 %v96_v51  ;;  %419 = vmatpush1.bf16.msra.mxu1 %v96_v51 }
  0x44   :  { %130 = vmatprep.subr.bf16.mxu0 %v99_v53  ;;  %404 = vmatprep.subr.bf16.mxu1 %v99_v53 }
  0x47   :  { %131 = vmatpush1.bf16.msra.mxu0 %v98_v58  ;;  %420 = vmatpush1.bf16.msra.mxu1 %v98_v58 }
  0x48   :  { %132 = vmatprep.subr.bf16.mxu0 %v101_v60  ;;  %405 = vmatprep.subr.bf16.mxu1 %v101_v60 }
  0x4b   :  { %133 = vmatpush1.bf16.msra.mxu0 %v100_v63  ;;  %421 = vmatpush1.bf16.msra.mxu1 %v100_v63 }
  0x4c   :  { %134 = vmatprep.subr.bf16.mxu0 %v103_v0  ;;  %406 = vmatprep.subr.bf16.mxu1 %v103_v0 }
  0x4f   :  { %135 = vmatpush1.bf16.msra.mxu0 %v102_v2  ;;  %422 = vmatpush1.bf16.msra.mxu1 %v102_v2 }
  0x50   :  { %136 = vmatprep.subr.bf16.mxu0 %v105_v3  ;;  %407 = vmatprep.subr.bf16.mxu1 %v105_v3 }
  0x53   :  { %137 = vmatpush1.bf16.msra.mxu0 %v104_v5  ;;  %423 = vmatpush1.bf16.msra.mxu1 %v104_v5 }
  0x54   :  { %138 = vmatprep.subr.bf16.mxu0 %v107_v6  ;;  %408 = vmatprep.subr.bf16.mxu1 %v107_v6 }
  0x57   :  { %139 = vmatpush1.bf16.msra.mxu0 %v106_v8  ;;  %424 = vmatpush1.bf16.msra.mxu1 %v106_v8 }
  0x58   :  { %140 = vmatprep.subr.bf16.mxu0 %v109_v9  ;;  %409 = vmatprep.subr.bf16.mxu1 %v109_v9 }
  0x5b   :  { %141 = vmatpush1.bf16.msra.mxu0 %v108_v11  ;;  %425 = vmatpush1.bf16.msra.mxu1 %v108_v11 }
  0x5c   :  { %142 = vmatprep.subr.bf16.mxu0 %v111_v12  ;;  %410 = vmatprep.subr.bf16.mxu1 %v111_v12 }
  0x5f   :  { %143 = vmatpush1.bf16.msra.mxu0 %v110_v14  ;;  %426 = vmatpush1.bf16.msra.mxu1 %v110_v14  ;;  %v252_v14 = vld [vmem:[%s718_s6] sm:$0xff] }
  0x60   :  { %144 = vmatprep.subr.bf16.mxu0 %v113_v15  ;;  %411 = vmatprep.subr.bf16.mxu1 %v113_v15  ;;  %v254_v15 = vld [vmem:[%s718_s6 + $0x10] sm:$0xff] }
  0x63   :  { %145 = vmatpush1.bf16.msra.mxu0 %v112_v17  ;;  %427 = vmatpush1.bf16.msra.mxu1 %v112_v17 }
  0x64   :  { %146 = vmatprep.subr.bf16.mxu0 %v115_v20  ;;  %412 = vmatprep.subr.bf16.mxu1 %v115_v20 }
  0x67   :  { %147 = vmatpush1.bf16.msra.mxu0 %v114_v21  ;;  %428 = vmatpush1.bf16.msra.mxu1 %v114_v21 }
  0x6a   :  { %149 = vmatmul.mubr.bf16.vlgmr.msra.gmra.mrb[0].mxu0 %v64_v22  ;;  %159 = vmatmul.mubr.bf16.vlgmr.msra.gmra.mrb[0].mxu1 %v66_v24 }
  0xce   :  { %v202_v28 = vpop.xlane.xlu0 %201 }
  0xcf   :  { %v233_v19 = vmul.f32 %v226_v26, %v202_v28  ;;  %v234_v29 = vmul.f32 %v230_v27, %v202_v28 }
  0xd1   :  { %v238_v31 = vrot.slane %v233_v19, %v629_v40  ;;  %v242_v32 = vrot.slane %v234_v29, %v629_v40 }
 0x13d   :  { %v150_v33 = vpop.f32.mrb[0].mxu0  ;;  %v160_v34 = vpop.f32.mrb[0].mxu1 }
 0x13e   :  { %v215_v35 = vmul.f32 %v208_v23, %v150_v33  ;;  %v152_v37 = vpop.f32.mrb[1].mxu0  ;;  %v162_v38 = vpop.f32.mrb[1].mxu1  ;;  %v219_v47 = vmul.f32 %v208_v23, %v160_v34 }
 0x13f   :  { %v216_v39 = vmul.f32 %v212_v30, %v152_v37  ;;  %v154_v41 = vpop.f32.mrb[2].mxu0  ;;  %v164_v42 = vpop.f32.mrb[2].mxu1  ;;  %v220_v36 = vmul.f32 %v212_v30, %v162_v38 }
 0x140   :  { %v649_v43 = vadd.f32 %v238_v31, %v215_v35  ;;  %v217_v44 = vmul.f32 %v208_v23, %v154_v41  ;;  %v156_v45 = vpop.f32.mrb[3].mxu0  ;;  %v165_v46 = vpop.f32.mrb[3].mxu1  ;;  %v659_v52 = vadd.f32 %v238_v31, %v219_v47  ;;  %v256_v35 = vld [vmem:[%s719_s7 + $0x8] sm:$0xff] }
 0x141   :  { %v651_v48 = vadd.f32 %v242_v32, %v216_v39  ;;  %v218_v49 = vmul.f32 %v212_v30, %v156_v45  ;;  %v661_v53 = vadd.f32 %v242_v32, %v220_v36  ;;  %v249_v36 = vld [vmem:[#allocation5] sm:$0xff] }
 0x142   :  { %v653_v50 = vadd.f32 %v238_v31, %v217_v44  ;;  %v257_v44 = vld [vmem:[%s719_s7 + $0x10] sm:$0xff]  ;;  %s524_s7 = smov [#allocation7]  }
 0x143   :  { %v655_v40 = vadd.f32 %v242_v32, %v218_v49  ;;  %v258_v51 = vadd.f32 %v651_v48, %v649_v43  ;;  %v264_v55 = vadd.f32 %v661_v53, %v659_v52  ;;  %s384_s12 = sshll.u32 %s524_s7, 4  ;;  %s385_s12 = int_to_ptr.vmem [resolvable:$true] %s384_s12 }
 0x144   :  { %s489_s13 = scalar_lea.vmem %s385_s12, 768  ;;  %p494_p3 = scmp.lt.s32.totalorder %s385_s12, %s385_s12 }
 0x145   :  { %259 = vadd.xlane.f32.xlu0 %v258_v51  ;;  %v261_v54 = vadd.f32 %v655_v40, %v653_v50  ;;  %v340_v51 = vunpack.c.l.bf16 %v249_v36  ;;  %p490_p2 = scmp.ne.s32.totalorder %s385_s12, %s489_s13  ;;  %p495_p4 = scmp.lt.s32.totalorder %s489_s13, %s489_s13 }
 0x147   :  { %262 = vadd.xlane.f32.xlu1 %v261_v54  ;;  %v341_v54 = vunpack.c.h.bf16 %v249_v36  ;;  %p496_p5 = por %p495_p4, %p494_p3 }
 0x149   :  { %p497_p6 = pnand %p496_p5, %p490_p2 }
 0x14b   :  { %265 = vadd.xlane.f32.xlu1 %v264_v55  ;;  %v250_v55 = vld [vmem:[#allocation5 + $0x8] sm:$0xff] }
 0x1d2   :  { %v260_v57 = vpop.xlane.xlu0 %259 }
 0x1d3   :  { %v268_v58 = vmul.f32 0.00390625, %v260_v57 }
 0x1d4   :  { %v263_v59 = vpop.xlane.xlu1 %262 }
 0x1d5   :  { %v271_v60 = vsub.f32 %v649_v43, %v268_v58  ;;  %v272_v61 = vsub.f32 %v651_v48, %v268_v58  ;;  %v269_v62 = vmul.f32 0.00390625, %v263_v59 }
 0x1d7   :  { %v277_v63 = vmul.f32 %v271_v60, %v271_v60  ;;  %v278_v0 = vmul.f32 %v272_v61, %v272_v61  ;;  %v273_v1 = vsub.f32 %v653_v50, %v269_v62  ;;  %v274_v2 = vsub.f32 %v655_v40, %v269_v62 }
 0x1d8   :  { %v266_v3 = vpop.xlane.xlu1 %265  ;;  %v342_v62 = vunpack.c.l.bf16 %v250_v55 }
 0x1d9   :  { %v279_v4 = vmul.f32 %v273_v1, %v273_v1  ;;  %v280_v5 = vmul.f32 %v274_v2, %v274_v2  ;;  %v270_v6 = vmul.f32 0.00390625, %v266_v3  ;;  %v283_v7 = vadd.f32 %v278_v0, %v277_v63  ;;  %v251_v0 = vld [vmem:[#allocation5 + $0x10] sm:$0xff] }
 0x1da   :  { %v343_v63 = vunpack.c.h.bf16 %v250_v55 }
 0x1db   :  { %v275_v8 = vsub.f32 %v659_v52, %v270_v6  ;;  %v276_v9 = vsub.f32 %v661_v53, %v270_v6  ;;  %284 = vadd.xlane.f32.xlu0 %v283_v7  ;;  %v286_v10 = vadd.f32 %v280_v5, %v279_v4  ;;  %v344_v7 = vunpack.c.l.bf16 %v251_v0 }
 0x1dd   :  { %v281_v11 = vmul.f32 %v275_v8, %v275_v8  ;;  %v282_v12 = vmul.f32 %v276_v9, %v276_v9  ;;  %287 = vadd.xlane.f32.xlu1 %v286_v10 }
 0x1df   :  { %v289_v13 = vadd.f32 %v282_v12, %v281_v11 }
 0x1e1   :  { %290 = vadd.xlane.f32.xlu0 %v289_v13 }
 0x1ee   :  { %318 = vperm.xlu1 %437, %v252_v14  }
 0x1f2   :  { %328 = vperm.xlu1 %437, %v254_v15  }
 0x1f7   :  { %323 = vperm.xlu0 %438, %v253_v16  }
 0x268   :  { %v285_v17 = vpop.xlane.xlu0 %284 }
 0x269   :  { %v292_v20 = vmul.f32 0.003921569, %v285_v17 }
 0x26a   :  { %v288_v21 = vpop.xlane.xlu1 %287 }
 0x26b   :  { %439 = vrsqrt.f32 %v292_v20  ;;  %v293_v22 = vmul.f32 0.003921569, %v288_v21  ;;  %vm297_vm1 = vcmp.eq.f32.partialorder %v292_v20, inf  ;;  %v300_v19 = vand.u32 2147483648, %v292_v20 }
 0x26c   :  { %vm299_vm2 = vcmp.eq.f32.partialorder %v292_v20, 0.0 }
 0x26d   :  { %441 = vrsqrt.f32 %v293_v22  ;;  %vm304_vm3 = vcmp.eq.f32.partialorder %v293_v22, inf  ;;  %v307_v31 = vand.u32 2147483648, %v293_v22  ;;  %vm306_vm4 = vcmp.eq.f32.partialorder %v293_v22, 0.0 }
 0x26e   :  { %v291_v24 = vpop.xlane.xlu0 %290  ;;  %v319_v47 = vpop.permute.xlu1 %318 }
 0x26f   :  { %v294_v25 = vmul.f32 0.003921569, %v291_v24  ;;  %v331_v56 = vmul.f32 %v319_v47, %v649_v43  ;;  %v332_v57 = vmul.f32 %v319_v47, %v651_v48  ;;  %v345_v48 = vunpack.c.h.bf16 %v251_v0 }
 0x271   :  { %443 = vrsqrt.f32 %v294_v25  ;;  %vm311_vm5 = vcmp.eq.f32.partialorder %v294_v25, inf  ;;  %v314_v39 = vand.u32 2147483648, %v294_v25  ;;  %vm313_vm6 = vcmp.eq.f32.partialorder %v294_v25, 0.0 }
 0x272   :  { %v329_v49 = vpop.permute.xlu1 %328 }
 0x273   :  { %v335_v11 = vmul.f32 %v329_v49, %v659_v52  ;;  %v336_v12 = vmul.f32 %v329_v49, %v661_v53 }
 0x275   :  { %v440_v26 = vpop.eup %439 }
 0x276   :  { %v296_v27 = vmul.f32 %v440_v26, %v292_v20  ;;  %v324_v59 = vpop.permute.xlu0 %323 }
 0x277   :  { %v442_v28 = vpop.eup %441  ;;  %v333_v3 = vmul.f32 %v324_v59, %v653_v50  ;;  %v334_v4 = vmul.f32 %v324_v59, %v655_v40 }
 0x278   :  { %v298_v29 = vsel %vm297_vm1, %v292_v20, %v296_v27  ;;  %v303_v23 = vmul.f32 %v442_v28, %v293_v22 }
 0x279   :  { %v301_v30 = vsel %vm299_vm2, %v300_v19, %v298_v29 }
 0x27a   :  { %v337_v32 = vmul.f32 %v301_v30, %v255_v18  ;;  %v305_v33 = vsel %vm304_vm3, %v293_v22, %v303_v23 }
 0x27b   :  { %v444_v34 = vpop.eup %443  ;;  %v308_v37 = vsel %vm306_vm4, %v307_v31, %v305_v33 }
 0x27c   :  { %348 = vperm.xlu1 %437, %v337_v32   ;;  %v310_v38 = vmul.f32 %v444_v34, %v294_v25  ;;  %v338_v41 = vmul.f32 %v308_v37, %v256_v35 }
 0x27e   :  { %v312_v42 = vsel %vm311_vm5, %v294_v25, %v310_v38 }
 0x27f   :  { %v315_v45 = vsel %vm313_vm6, %v314_v39, %v312_v42 }
 0x280   :  { %353 = vperm.xlu1 %437, %v338_v41   ;;  %v339_v46 = vmul.f32 %v315_v45, %v257_v44 }
 0x284   :  { %358 = vperm.xlu1 %437, %v339_v46  }
 0x2fb   :  { %v349_v58 = vpop.permute.xlu1 %348 }
 0x2fc   :  { %v361_v60 = vmul.f32 %v349_v58, %v340_v51  ;;  %v362_v61 = vmul.f32 %v349_v58, %v341_v54 }
 0x2fe   :  { %v367_v1 = vadd.f32 %v361_v60, %v331_v56  ;;  %v368_v2 = vadd.f32 %v362_v61, %v332_v57 }
 0x2ff   :  { %v354_v5 = vpop.permute.xlu1 %353 }
 0x300   :  { %373 = vst [vmem:[#allocation7] sm:$0xff] %v367_v1  ;;  %374 = vst [vmem:[#allocation7 + $0x8] sm:$0xff] %v368_v2  ;;  %v363_v6 = vmul.f32 %v354_v5, %v342_v62  ;;  %v364_v43 = vmul.f32 %v354_v5, %v343_v63 }
 0x302   :  { %v369_v8 = vadd.f32 %v363_v6, %v333_v3  ;;  %v370_v9 = vadd.f32 %v364_v43, %v334_v4 }
 0x303   :  { %v359_v10 = vpop.permute.xlu1 %358 }
 0x304   :  { %375 = vst [vmem:[#allocation7 + $0x10] sm:$0xff] %v369_v8  ;;  %376 = vst [vmem:[#allocation7 + $0x18] sm:$0xff] %v370_v9  ;;  %v365_v50 = vmul.f32 %v359_v10, %v344_v7  ;;  %v366_v40 = vmul.f32 %v359_v10, %v345_v48 }
 0x306   :  { %v371_v13 = vadd.f32 %v365_v50, %v335_v11  ;;  %v372_v14 = vadd.f32 %v366_v40, %v336_v12 }
 0x308   :  { %377 = vst [vmem:[#allocation7 + $0x20] sm:$0xff] %v371_v13  ;;  %378 = vst [vmem:[#allocation7 + $0x28] sm:$0xff] %v372_v14 }
 0x309   :  { %500 = shalt.err (!%p497_p6)
}
 0x30a   :  { %s501_s18 = scalar_lea.hbm %s720_s8, 768 }
 0x30b   :  { %p502_p7 = scmp.ne.s32.totalorder %s720_s8, %s501_s18  ;;  %p505_p8 = scmp.lt.u32.totalorder %s501_s18, %s720_s8 }
 0x30d   :  { %p507_p9 = pnand %p505_p8, %p502_p7 }
 0x30f   :  { %510 = shalt.err (!%p507_p9)
}
 0x310   :  { %390 = dma.vmem_to_hbm [thread:$0]  %s385_s12, 768, %s720_s8, [#allocation4], %s518_s15, %s518_s15, %s519_s16  }
 0x311   :  { %515 = dma.done.wait [#allocation4], 768  }
 0x312   :  { %516 = vsyncadd [#allocation4], 4294966528 }
 0x313   :  { %394 = vsyncpa [#allocation3], 1 }
 0x314   :  { %395 = vsyncpa [#allocation6], 1 }
 0x315   :  { %396 = vsyncpa [#allocation4], 1 }

</bundles_post_ra>
